<compile_context>
chip_gen: v5e
topology: v5e:2x2
jax: 0.10.0
libtpu: 0.0.40
codegen_flags: <defaults>
</compile_context>

<pallas_src>
import math

import jax
import jax.numpy as jnp
from jax.experimental import pallas as pl
from jax.experimental.pallas import tpu as pltpu

_LANES = 128


def _identity_dma_kernel(x_ref, o_ref, sem):
    # Single HBM -> HBM DMA: copies the whole input buffer into the output
    # buffer. One read + one write of HBM, nothing else.
    cp = pltpu.make_async_copy(x_ref, o_ref, sem)
    cp.start()
    cp.wait()


@jax.jit
def efficientnet_forward(x: jax.Array) -> jax.Array:
    """Pallas implementation of EfficientNet.forward (identity)."""
    orig_shape = x.shape
    total = math.prod(orig_shape)

    # Free, layout-preserving view as a lane-dense 2-D slab when possible.
    # Never pads, never slices — purely a metadata reshape.
    if total % _LANES == 0 and total > 0:
        x_view = x.reshape(total // _LANES, _LANES)
    else:
        x_view = x

    out = pl.pallas_call(
        _identity_dma_kernel,
        out_shape=jax.ShapeDtypeStruct(x_view.shape, x_view.dtype),
        in_specs=[pl.BlockSpec(memory_space=pl.ANY)],
        out_specs=pl.BlockSpec(memory_space=pl.ANY),
        scratch_shapes=[pltpu.SemaphoreType.DMA(())],
    )(x_view)

    return out.reshape(orig_shape)


if __name__ == "__main__":
    key = jax.random.PRNGKey(0)
    # Small NCHW input consistent with an EfficientNet-style feature map.
    x = jax.random.normal(key, (2, 4, 16, 16), dtype=jnp.float32)

    y = efficientnet_forward(x)
    y = jax.block_until_ready(y)

    # Forward is identity — verify exact pass-through semantics.
    assert y.shape == x.shape
    assert y.dtype == x.dtype
    assert bool(jnp.all(y == x))

    print("KERNEL_OK")
</pallas_src>

<mosaic_0001>
module attributes {stable_mosaic.version = 11 : i64} {
  func.func @_identity_dma_kernel(%arg0: memref<16x128xf32, #tpu.memory_space<any>>, %arg1: memref<16x128xf32, #tpu.memory_space<any>>, %arg2: memref<!tpu.dma_semaphore, #tpu.memory_space<semaphore_mem>>) attributes {dimension_semantics = [], scalar_prefetch = 0 : i64, scratch_operands = 1 : i64, tpu.core_type = #tpu.core_type<tc>} {
    tpu.enqueue_dma source(%arg0 : memref<16x128xf32, #tpu.memory_space<any>>) target(%arg1 : memref<16x128xf32, #tpu.memory_space<any>>) target_semaphore(%arg2 : memref<!tpu.dma_semaphore, #tpu.memory_space<semaphore_mem>>)
    tpu.wait_dma2 semaphore(%arg2 : memref<!tpu.dma_semaphore, #tpu.memory_space<semaphore_mem>>) src(%arg0 : memref<16x128xf32, #tpu.memory_space<any>>) dst(%arg1 : memref<16x128xf32, #tpu.memory_space<any>>)
    return
  }
}

</mosaic_0001>

<bundles_post_ra>
// kernel: efficientnet_forward.1
= control target key start
LH: loop header
LB: loop body
LE: loop exit
PB: predicated region body
PF: predicated region fallthrough
CT: control target
= control target key end

     0   :  { %s64_s0 = inlined_call_operand.vmem [shape: f32[16,128], index: 0, kind: input, shape index: {}]   ;;  %s65_s1 = inlined_call_operand.vmem [shape: f32[16,128], index: 1, kind: output, shape index: {}]  }
   0x1   :  { %v16_v0 = vld [vmem:[%s64_s0] sm:$0xff]  ;;  %v18_v1 = vld [vmem:[%s64_s0 + $0x8] sm:$0xff] }
   0x2   :  { %17 = vst [vmem:[%s65_s1] sm:$0xff] %v16_v0 }
   0x3   :  { %19 = vst [vmem:[%s65_s1 + $0x8] sm:$0xff] %v18_v1 }
   0x4   :  { %25 = vsyncadd [#allocation2], 256 }
   0x5   :  { %40 = dma.done.wait [#allocation2], 256 }
   0x6   :  { %41 = vsyncadd [#allocation2], 4294967040 }
   0x7   :  { %29 = vsyncmov [#allocation2] }
   0xa   :  { %s30_s14 = vpop.sfrf %29 }
   0xb   :  { %p39_p0 = scmp.ne.s32.totalorder %s30_s14, 0 }
   0xd   :  { %34 = shalt.err (%p39_p0)  }

</bundles_post_ra>
